<compile_context>
chip_gen: v6e
topology: v6e:2x2x1
jax: 0.10.0
libtpu: 0.0.40
codegen_flags: <defaults>
</compile_context>

<pallas_src>
import jax
import jax.numpy as jnp
from jax.experimental import pallas as pl
from jax.experimental.pallas import tpu as pltpu


def _tv_kernel(x_ref, out_ref):
    # x_ref: (B, H, W) in native dtype; cast to f32 after the DMA.
    x = x_ref[...].astype(jnp.float32)

    dh = x[:, 1:, :] - x[:, :-1, :]   # vertical (height) differences
    dw = x[:, :, 1:] - x[:, :, :-1]   # horizontal (width) differences

    s_h = jnp.sum(dh * dh)            # per-block scalar partial sums
    s_w = jnp.sum(dw * dw)

    # Lane-dense unmasked store of the (1, 8, 128) partial tile:
    #   [0, 0, 0] = h partial, [0, 0, 1] = w partial, rest zeros.
    sub = jax.lax.broadcasted_iota(jnp.int32, out_ref.shape, 1)
    lane = jax.lax.broadcasted_iota(jnp.int32, out_ref.shape, 2)
    vals = jnp.where(lane == 0, s_h, jnp.where(lane == 1, s_w, 0.0))
    out_ref[...] = jnp.where(sub == 0, vals, 0.0).astype(jnp.float32)


def tv_loss(x, tv_loss_weight=1.0):
    """x: (N, C, H, W), any float dtype — same convention as the PyTorch module."""
    n, c, h, w = x.shape
    nc = n * c
    x_flat = x.reshape(nc, h, w)  # keep native dtype; cast happens in-kernel

    # Pick a block of B planes targeting ~1 MiB of f32 work per step
    # (double-buffered input + f32 temporaries stay well under every
    # generation's scoped VMEM limit).
    plane_f32_bytes = h * w * 4
    target_bytes = 1 << 20
    bpp = max(1, target_bytes // plane_f32_bytes)  # planes per block
    bpp = min(bpp, nc)
    num_blocks = -(-nc // bpp)  # ceil

    # Pad the plane axis with zero planes: zero planes contribute exactly 0 to
    # both diff sums, so correctness is unaffected.
    padded = num_blocks * bpp
    if padded != nc:
        x_flat = jnp.pad(x_flat, ((0, padded - nc), (0, 0), (0, 0)))

    # TODO(synk): tile over H with a 1-row halo for planes whose single-plane
    # f32 footprint exceeds a few MiB (v7x has only 64 MiB physical VMEM).
    block_native_bytes = bpp * h * w * x_flat.dtype.itemsize
    est = 2 * block_native_bytes + 8 * bpp * plane_f32_bytes + (1 << 20)
    vmem_limit = int(min(max(est, 32 * 1024 * 1024), 100 * 1024 * 1024))

    partials = pl.pallas_call(
        _tv_kernel,
        out_shape=jax.ShapeDtypeStruct((num_blocks, 8, 128), jnp.float32),
        grid=(num_blocks,),
        in_specs=[pl.BlockSpec((bpp, h, w), lambda i: (i, 0, 0))],
        out_specs=pl.BlockSpec((1, 8, 128), lambda i: (i, 0, 0)),
        compiler_params=pltpu.CompilerParams(
            dimension_semantics=("parallel",),
            vmem_limit_bytes=vmem_limit,
        ),
    )(x_flat)

    h_tv = jnp.sum(partials[:, 0, 0])
    w_tv = jnp.sum(partials[:, 0, 1])

    count_h = c * (h - 1) * w
    count_w = c * h * (w - 1)
    return tv_loss_weight * 2.0 * (h_tv / count_h + w_tv / count_w) / n


def tv_loss_ref(x, tv_loss_weight=1.0):
    """Pure-JAX reference mirroring the PyTorch forward."""
    n, c, h, w = x.shape
    xf = x.astype(jnp.float32)
    count_h = c * (h - 1) * w
    count_w = c * h * (w - 1)
    h_tv = jnp.sum((xf[:, :, 1:, :] - xf[:, :, : h - 1, :]) ** 2)
    w_tv = jnp.sum((xf[:, :, :, 1:] - xf[:, :, :, : w - 1]) ** 2)
    return tv_loss_weight * 2.0 * (h_tv / count_h + w_tv / count_w) / n


if __name__ == "__main__":
    key = jax.random.PRNGKey(0)
    x = jax.random.normal(key, (2, 4, 16, 16), dtype=jnp.float32)

    out = jax.block_until_ready(tv_loss(x, tv_loss_weight=1.0))
    ref = jax.block_until_ready(tv_loss_ref(x, tv_loss_weight=1.0))

    assert jnp.allclose(out, ref, rtol=1e-5, atol=1e-5), (out, ref)
    print("KERNEL_OK")
</pallas_src>

<mosaic_0001>
module attributes {stable_mosaic.version = 11 : i64} {
  func.func @_tv_kernel(%arg0: i32, %arg1: memref<8x16x16xf32, #tpu.memory_space<vmem>>, %arg2: memref<1x8x128xf32, #tpu.memory_space<vmem>>) attributes {dimension_semantics = [#tpu.dimension_semantics<parallel>], iteration_bounds = array<i64: 1>, scalar_prefetch = 0 : i64, scratch_operands = 0 : i64, tpu.core_type = #tpu.core_type<tc>, window_params = [{transform_indices = @transform_0, window_bounds = array<i64: 8, 16, 16>}, {transform_indices = @transform_1, window_bounds = array<i64: 1, 8, 128>}]} {
    %c0 = arith.constant 0 : index
    %c0_0 = arith.constant 0 : index
    %c0_1 = arith.constant 0 : index
    %0 = vector.load %arg1[%c0, %c0_0, %c0_1] : memref<8x16x16xf32, #tpu.memory_space<vmem>>, vector<8x16x16xf32>
    %1 = vector.extract_strided_slice %0 {offsets = [0, 1, 0], sizes = [8, 15, 16], strides = [1, 1, 1]} : vector<8x16x16xf32> to vector<8x15x16xf32>
    %2 = vector.extract_strided_slice %0 {offsets = [0, 0, 0], sizes = [8, 15, 16], strides = [1, 1, 1]} : vector<8x16x16xf32> to vector<8x15x16xf32>
    %3 = arith.subf %1, %2 : vector<8x15x16xf32>
    %4 = vector.extract_strided_slice %0 {offsets = [0, 0, 1], sizes = [8, 16, 15], strides = [1, 1, 1]} : vector<8x16x16xf32> to vector<8x16x15xf32>
    %5 = vector.extract_strided_slice %0 {offsets = [0, 0, 0], sizes = [8, 16, 15], strides = [1, 1, 1]} : vector<8x16x16xf32> to vector<8x16x15xf32>
    %6 = arith.subf %4, %5 : vector<8x16x15xf32>
    %7 = arith.mulf %3, %3 : vector<8x15x16xf32>
    %8 = vector.shape_cast %7 : vector<8x15x16xf32> to vector<1x8x15x16xf32>
    %cst = arith.constant dense<0.000000e+00> : vector<1xf32>
    %9 = vector.multi_reduction <add>, %8, %cst [1, 2, 3] : vector<1x8x15x16xf32> to vector<1xf32>
    %10 = vector.shape_cast %9 : vector<1xf32> to vector<1x1x1x1xf32>
    %11 = vector.extract %10[0, 0, 0, 0] : f32 from vector<1x1x1x1xf32>
    %12 = arith.mulf %6, %6 : vector<8x16x15xf32>
    %13 = vector.shape_cast %12 : vector<8x16x15xf32> to vector<1x8x16x15xf32>
    %cst_2 = arith.constant dense<0.000000e+00> : vector<1xf32>
    %14 = vector.multi_reduction <add>, %13, %cst_2 [1, 2, 3] : vector<1x8x16x15xf32> to vector<1xf32>
    %15 = vector.shape_cast %14 : vector<1xf32> to vector<1x1x1x1xf32>
    %16 = vector.extract %15[0, 0, 0, 0] : f32 from vector<1x1x1x1xf32>
    %17 = tpu.iota {dimensions = array<i32: 1>} : vector<1x8x128xi32>
    %18 = tpu.iota {dimensions = array<i32: 2>} : vector<1x8x128xi32>
    %c0_i32 = arith.constant 0 : i32
    %19 = vector.broadcast %c0_i32 : i32 to vector<1x8x128xi32>
    %20 = arith.cmpi eq, %18, %19 : vector<1x8x128xi32>
    %c1_i32 = arith.constant 1 : i32
    %21 = vector.broadcast %c1_i32 : i32 to vector<1x8x128xi32>
    %22 = arith.cmpi eq, %18, %21 : vector<1x8x128xi32>
    %cst_3 = arith.constant 0.000000e+00 : f32
    %23 = vector.broadcast %16 : f32 to vector<1x8x128xf32>
    %24 = vector.broadcast %cst_3 : f32 to vector<1x8x128xf32>
    %25 = arith.select %22, %23, %24 : vector<1x8x128xi1>, vector<1x8x128xf32>
    %26 = vector.broadcast %11 : f32 to vector<1x8x128xf32>
    %27 = arith.select %20, %26, %25 : vector<1x8x128xi1>, vector<1x8x128xf32>
    %c0_i32_4 = arith.constant 0 : i32
    %28 = vector.broadcast %c0_i32_4 : i32 to vector<1x8x128xi32>
    %29 = arith.cmpi eq, %17, %28 : vector<1x8x128xi32>
    %cst_5 = arith.constant 0.000000e+00 : f32
    %30 = vector.broadcast %cst_5 : f32 to vector<1x8x128xf32>
    %31 = arith.select %29, %27, %30 : vector<1x8x128xi1>, vector<1x8x128xf32>
    %c0_6 = arith.constant 0 : index
    %c0_7 = arith.constant 0 : index
    %c0_8 = arith.constant 0 : index
    %32 = vector.load %arg2[%c0_6, %c0_7, %c0_8] : memref<1x8x128xf32, #tpu.memory_space<vmem>>, vector<1x8x128xf32>
    tpu.vector_store %arg2[%c0_6, %c0_7, %c0_8], %31 {strides = array<i32>} : memref<1x8x128xf32, #tpu.memory_space<vmem>>, vector<1x8x128xf32>,
    return
  }
  func.func @transform_0(%arg0: i32) -> (i32, i32, i32) {
    %c0_i32 = arith.constant 0 : i32
    %c0_i32_0 = arith.constant 0 : i32
    %c0_i32_1 = arith.constant 0 : i32
    return %arg0, %c0_i32, %c0_i32_0 : i32, i32, i32
  }
  func.func @transform_1(%arg0: i32) -> (i32, i32, i32) {
    %c0_i32 = arith.constant 0 : i32
    %c0_i32_0 = arith.constant 0 : i32
    %c0_i32_1 = arith.constant 0 : i32
    return %arg0, %c0_i32, %c0_i32_0 : i32, i32, i32
  }
}

</mosaic_0001>

<bundles_post_ra>
// kernel: tpu_custom_call.1
= control target key start
LH: loop header
LB: loop body
LE: loop exit
PB: predicated region body
PF: predicated region fallthrough
CT: control target
= control target key end

     0   :  { %6 = vsyncpa [#allocation3], 0  ;;  %s676_s0 = inlined_call_operand.hbm [shape: f32[8,16,16], index: 0, kind: input, shape index: {}]   ;;  %s677_s1 = inlined_call_operand.hbm [shape: f32[1,8,128], index: 1, kind: output, shape index: {}]  }
   0x1   :  { %7 = vsyncpa [#allocation4], 0  ;;  %s494_s6 = smov [#allocation2]  }
   0x2   :  { %s13_s7 = sshll.u32 %s494_s6, 4  ;;  %s14_s7 = int_to_ptr.vmem [resolvable:$true] %s13_s7 }
   0x3   :  { %s458_s8 = scalar_lea.vmem %s14_s7, 2048  ;;  %p463_p1 = scmp.lt.s32.totalorder %s14_s7, %s14_s7 }
   0x4   :  { %p459_p0 = scmp.ne.s32.totalorder %s14_s7, %s458_s8  ;;  %p464_p2 = scmp.lt.s32.totalorder %s458_s8, %s458_s8 }
   0x6   :  { %p465_p3 = por %p464_p2, %p463_p1 }
   0x8   :  { %p466_p4 = pnand %p465_p3, %p459_p0 }
   0xa   :  { %469 = shalt.err (!%p466_p4)
}
   0xb   :  { %s495_s9 = smov 128   ;;  %s496_s10 = smov 8  }
   0xc   :  { %19 = dma.hbm_to_vmem [thread:$0]  %s676_s0, 2048, %s14_s7, [#allocation3], %s495_s9, %s495_s9, %s496_s10  }
   0xd   :  { %490 = dma.done.wait [#allocation3], 2048  }
   0xe   :  { %491 = vsyncadd [#allocation3], 4294965248  ;;  %v513_v0 = vld [vmem:[#allocation2] sm:$0xff]  ;;  %v515_v1 = vld [vmem:[#allocation2 + $0x10] sm:$0xff]  ;;  %s497_s13 = smov 1   ;;  %vm55_vm0 = vcmask 1040384  }
   0xf   :  { %112 = vrot.lane.b32.xlu0 %v513_v0, %s497_s13  ;;  %116 = vrot.lane.b32.xlu1 %v515_v1, %s497_s13  ;;  %v519_v2 = vld [vmem:[#allocation2 + $0x8] sm:$0xff]  ;;  %v521_v3 = vld [vmem:[#allocation2 + $0x18] sm:$0xff]  ;;  %v525_v4 = vld [vmem:[#allocation2 + $0x20] sm:$0xff]  ;;  %v56_v16 = vrot.slane %v513_v0, 7  ;;  %v59_v18 = vrot.slane %v515_v1, 7  ;;  %vm208_vm1 = vcmask 1046528  }
  0x10   :  { %v527_v5 = vld [vmem:[#allocation2 + $0x28] sm:$0xff]  ;;  %v531_v6 = vld [vmem:[#allocation2 + $0x30] sm:$0xff]  ;;  %v533_v7 = vld [vmem:[#allocation2 + $0x38] sm:$0xff]  ;;  %v57_v17 = vrot.slane %v519_v2, 7  ;;  %v60_v20 = vrot.slane %v521_v3, 7  ;;  %v62_v28 = vrot.slane %v525_v4, 7 }
  0x11   :  { %v537_v8 = vld [vmem:[#allocation2 + $0x40] sm:$0xff]  ;;  %v539_v9 = vld [vmem:[#allocation2 + $0x48] sm:$0xff]  ;;  %v543_v10 = vld [vmem:[#allocation2 + $0x50] sm:$0xff]  ;;  %v96_v21 = vsub.f32 %v513_v0, %v56_v16  ;;  %v98_v25 = vsub.f32 %v515_v1, %v59_v18  ;;  %v63_v29 = vrot.slane %v527_v5, 7  ;;  %vm249_vm2 = vcmask 130048   ;;  %s498_s0 = smov 127  }
  0x12   :  { %v545_v11 = vld [vmem:[#allocation2 + $0x58] sm:$0xff]  ;;  %v549_v12 = vld [vmem:[#allocation2 + $0x60] sm:$0xff]  ;;  %v551_v13 = vld [vmem:[#allocation2 + $0x68] sm:$0xff]  ;;  %v58_v19 = vsel %vm55_vm0, %v56_v16, %v57_v17  ;;  %v61_v23 = vsel %vm55_vm0, %v59_v18, %v60_v20  ;;  %vm251_vm3 = vcmask 129024   ;;  %v100_v35 = vsub.f32 %v525_v4, %v62_v28  ;;  %s499_s16 = smov [#allocation5]  }
  0x13   :  { %114 = vrot.lane.b32.xlu0 %v519_v2, %s497_s13  ;;  %118 = vrot.lane.b32.xlu1 %v521_v3, %s497_s13  ;;  %v555_v14 = vld [vmem:[#allocation2 + $0x70] sm:$0xff]  ;;  %v557_v15 = vld [vmem:[#allocation2 + $0x78] sm:$0xff]  ;;  %v97_v22 = vsub.f32 %v519_v2, %v58_v19  ;;  %v176_v24 = vmul.f32 %v96_v21, %v96_v21  ;;  %v99_v27 = vsub.f32 %v521_v3, %v61_v23  ;;  %v65_v40 = vrot.slane %v531_v6, 7  ;;  %s431_s17 = sshll.u32 %s499_s16, 4  ;;  %s432_s17 = int_to_ptr.vmem [resolvable:$true] %s431_s17 }
  0x14   :  { %v178_v31 = vmul.f32 %v98_v25, %v98_v25  ;;  %v64_v34 = vsel %vm55_vm0, %v62_v28, %v63_v29  ;;  %v66_v41 = vrot.slane %v533_v7, 7  ;;  %v180_v49 = vmul.f32 %v100_v35, %v100_v35  ;;  %s470_s18 = scalar_lea.vmem %s432_s17, 128  ;;  %p475_p6 = scmp.lt.s32.totalorder %s432_s17, %s432_s17 }
  0x15   :  { %v177_v26 = vmul.f32 %v97_v22, %v97_v22  ;;  %v209_v30 = vrot.slane %v176_v24, 1  ;;  %v179_v33 = vmul.f32 %v99_v27, %v99_v27  ;;  %v101_v39 = vsub.f32 %v527_v5, %v64_v34  ;;  %p471_p5 = scmp.ne.s32.totalorder %s432_s17, %s470_s18  ;;  %p476_p7 = scmp.lt.s32.totalorder %s470_s18, %s470_s18 }
  0x16   :  { %v212_v36 = vrot.slane %v178_v31, 1  ;;  %v67_v51 = vsel %vm55_vm0, %v65_v40, %v66_v41  ;;  %v215_v60 = vrot.slane %v180_v49, 1  ;;  %v102_v62 = vsub.f32 %v531_v6, %v65_v40 }
  0x17   :  { %120 = vrot.lane.b32.xlu0 %v525_v4, %s497_s13  ;;  %122 = vrot.lane.b32.xlu1 %v527_v5, %s497_s13  ;;  %v210_v32 = vrot.slane %v177_v26, 1  ;;  %v213_v38 = vrot.slane %v179_v33, 1  ;;  %v181_v50 = vmul.f32 %v101_v39, %v101_v39  ;;  %v103_v63 = vsub.f32 %v533_v7, %v67_v51  ;;  %p477_p8 = por %p476_p7, %p475_p6 }
  0x18   :  { %v182_v23 = vmul.f32 %v102_v62, %v102_v62  ;;  %vm371_vm4 = vcmask 121856  }
  0x19   :  { %v211_v37 = vsel %vm208_vm1, %v209_v30, %v210_v32  ;;  %v252_v45 = vsel %vm251_vm3, %v210_v32, 0.0  ;;  %v214_v48 = vsel %vm208_vm1, %v212_v36, %v213_v38  ;;  %v216_v61 = vrot.slane %v181_v50, 1  ;;  %p478_p9 = pnand %p477_p8, %p471_p5 }
  0x1a   :  { %v250_v44 = vsel %vm249_vm2, %v211_v37, 0.0  ;;  %v254_v56 = vsel %vm249_vm2, %v214_v48, 0.0  ;;  %v183_v24 = vmul.f32 %v103_v63, %v103_v63  ;;  %v71_v36 = vrot.slane %v543_v10, 7 }
  0x1b   :  { %124 = vrot.lane.b32.xlu0 %v531_v6, %s497_s13  ;;  %126 = vrot.lane.b32.xlu1 %v533_v7, %s497_s13  ;;  %v253_v53 = vadd.f32 %v252_v45, %v250_v44  ;;  %v217_v22 = vsel %vm208_vm1, %v215_v60, %v216_v61  ;;  %v72_v37 = vrot.slane %v545_v11, 7 }
  0x1c   :  { %v258_v30 = vsel %vm249_vm2, %v217_v22, 0.0  ;;  %v219_v33 = vrot.slane %v183_v24, 1 }
  0x1d   :  { %v255_v17 = vadd.f32 %v254_v56, %v253_v53  ;;  %v106_v56 = vsub.f32 %v543_v10, %v71_v36 }
  0x1f   :  { %128 = vrot.lane.b32.xlu0 %v537_v8, %s497_s13  ;;  %130 = vrot.lane.b32.xlu1 %v539_v9, %s497_s13 }
  0x23   :  { %132 = vrot.lane.b32.xlu0 %v543_v10, %s497_s13  ;;  %134 = vrot.lane.b32.xlu1 %v545_v11, %s497_s13 }
  0x27   :  { %136 = vrot.lane.b32.xlu0 %v549_v12, %s497_s13  ;;  %138 = vrot.lane.b32.xlu1 %v551_v13, %s497_s13 }
  0x2b   :  { %140 = vrot.lane.b32.xlu0 %v555_v14, %s497_s13  ;;  %142 = vrot.lane.b32.xlu1 %v557_v15, %s497_s13 }
  0x81   :  { %v113_v42 = vpop.permute.xlu0 %112  ;;  %v117_v43 = vpop.permute.xlu1 %116 }
  0x82   :  { %v160_v46 = vsub.f32 %v513_v0, %v113_v42  ;;  %v162_v47 = vsub.f32 %v515_v1, %v117_v43  ;;  %v68_v0 = vrot.slane %v537_v8, 7  ;;  %v69_v1 = vrot.slane %v539_v9, 7 }
  0x84   :  { %v291_v52 = vmul.f32 %v160_v46, %v160_v46  ;;  %v293_v57 = vmul.f32 %v162_v47, %v162_v47  ;;  %v70_v25 = vsel %vm55_vm0, %v68_v0, %v69_v1  ;;  %v104_v34 = vsub.f32 %v537_v8, %v68_v0 }
  0x85   :  { %v115_v54 = vpop.permute.xlu0 %114  ;;  %v119_v55 = vpop.permute.xlu1 %118  ;;  %v105_v35 = vsub.f32 %v539_v9, %v70_v25  ;;  %v73_v47 = vsel %vm55_vm0, %v71_v36, %v72_v37  ;;  %v264_v0 = vsel %vm251_vm3, %v219_v33, 0.0 }
  0x86   :  { %v161_v58 = vsub.f32 %v519_v2, %v115_v54  ;;  %323 = vrot.lane.b32.xlu0 %v291_v52, %s498_s0  ;;  %v163_v59 = vsub.f32 %v521_v3, %v119_v55  ;;  %v256_v2 = vsel %vm251_vm3, %v213_v38, 0.0  ;;  %v184_v45 = vmul.f32 %v104_v34, %v104_v34 }
  0x87   :  { %v257_v27 = vadd.f32 %v256_v2, %v255_v17  ;;  %v185_v46 = vmul.f32 %v105_v35, %v105_v35  ;;  %v186_v17 = vmul.f32 %v106_v56, %v106_v56 }
  0x88   :  { %v292_v16 = vmul.f32 %v161_v58, %v161_v58  ;;  %v294_v20 = vmul.f32 %v163_v59, %v163_v59  ;;  %v221_v54 = vrot.slane %v184_v45, 1  ;;  %v74_v58 = vrot.slane %v549_v12, 7 }
  0x89   :  { %v121_v18 = vpop.permute.xlu0 %120  ;;  %v123_v19 = vpop.permute.xlu1 %122  ;;  %v259_v39 = vadd.f32 %v258_v30, %v257_v27  ;;  %v222_v55 = vrot.slane %v185_v46, 1  ;;  %v75_v59 = vrot.slane %v551_v13, 7  ;;  %v77_v30 = vrot.slane %v555_v14, 7 }
  0x8a   :  { %327 = vrot.lane.b32.xlu0 %v293_v57, %s498_s0  ;;  %325 = vrot.lane.b32.xlu1 %v292_v16, %s498_s0  ;;  %v164_v3 = vsub.f32 %v525_v4, %v121_v18  ;;  %v165_v21 = vsub.f32 %v527_v5, %v123_v19  ;;  %v218_v5 = vrot.slane %v182_v23, 1  ;;  %v107_v57 = vsub.f32 %v545_v11, %v73_v47 }
  0x8b   :  { %v76_v19 = vsel %vm55_vm0, %v74_v58, %v75_v59 }
  0x8c   :  { %v295_v26 = vmul.f32 %v164_v3, %v164_v3  ;;  %v296_v31 = vmul.f32 %v165_v21, %v165_v21  ;;  %v220_v44 = vsel %vm208_vm1, %v218_v5, %v219_v33  ;;  %v187_v18 = vmul.f32 %v107_v57, %v107_v57 }
  0x8d   :  { %v125_v28 = vpop.permute.xlu0 %124  ;;  %v127_v29 = vpop.permute.xlu1 %126  ;;  %v262_v52 = vsel %vm249_vm2, %v220_v44, 0.0  ;;  %v268_v5 = vsel %vm251_vm3, %v222_v55, 0.0 }
  0x8e   :  { %329 = vrot.lane.b32.xlu1 %v294_v20, %s498_s0  ;;  %v166_v32 = vsub.f32 %v531_v6, %v125_v28  ;;  %331 = vrot.lane.b32.xlu0 %v295_v26, %s498_s0  ;;  %v167_v4 = vsub.f32 %v533_v7, %v127_v29  ;;  %v260_v6 = vsel %vm251_vm3, %v216_v61, 0.0  ;;  %v224_v26 = vrot.slane %v186_v17, 1 }
  0x8f   :  { %v261_v49 = vadd.f32 %v260_v6, %v259_v39  ;;  %v225_v27 = vrot.slane %v187_v18, 1  ;;  %v108_v28 = vsub.f32 %v549_v12, %v74_v58  ;;  %v109_v29 = vsub.f32 %v551_v13, %v76_v19 }
  0x90   :  { %v297_v38 = vmul.f32 %v166_v32, %v166_v32  ;;  %v298_v42 = vmul.f32 %v167_v4, %v167_v4  ;;  %v110_v39 = vsub.f32 %v555_v14, %v77_v30 }
  0x91   :  { %v129_v40 = vpop.permute.xlu0 %128  ;;  %v131_v41 = vpop.permute.xlu1 %130  ;;  %v263_v61 = vadd.f32 %v262_v52, %v261_v49  ;;  %v226_v34 = vsel %vm208_vm1, %v224_v26, %v225_v27  ;;  %v188_v35 = vmul.f32 %v108_v28, %v108_v28  ;;  %v189_v36 = vmul.f32 %v109_v29, %v109_v29 }
  0x92   :  { %333 = vrot.lane.b32.xlu1 %v296_v31, %s498_s0  ;;  %v168_v7 = vsub.f32 %v537_v8, %v129_v40  ;;  %335 = vrot.lane.b32.xlu0 %v297_v38, %s498_s0  ;;  %v169_v43 = vsub.f32 %v539_v9, %v131_v41  ;;  %v78_v31 = vrot.slane %v557_v15, 7  ;;  %v270_v37 = vsel %vm249_vm2, %v226_v34, 0.0 }
  0x93   :  { %v265_v20 = vadd.f32 %v264_v0, %v263_v61  ;;  %v227_v38 = vrot.slane %v188_v35, 1  ;;  %v228_v41 = vrot.slane %v189_v36, 1 }
  0x94   :  { %v299_v48 = vmul.f32 %v168_v7, %v168_v7  ;;  %v300_v53 = vmul.f32 %v169_v43, %v169_v43  ;;  %v190_v7 = vmul.f32 %v110_v39, %v110_v39 }
  0x95   :  { %v133_v50 = vpop.permute.xlu0 %132  ;;  %v135_v51 = vpop.permute.xlu1 %134  ;;  %v229_v44 = vsel %vm208_vm1, %v227_v38, %v228_v41 }
  0x96   :  { %337 = vrot.lane.b32.xlu1 %v298_v42, %s498_s0  ;;  %v170_v8 = vsub.f32 %v543_v10, %v133_v50  ;;  %339 = vrot.lane.b32.xlu0 %v299_v48, %s498_s0  ;;  %v171_v9 = vsub.f32 %v545_v11, %v135_v51  ;;  %v223_v11 = vsel %vm208_vm1, %v221_v54, %v222_v55  ;;  %v272_v42 = vsel %vm251_vm3, %v225_v27, 0.0 }
  0x97   :  { %v266_v22 = vsel %vm249_vm2, %v223_v11, 0.0  ;;  %v274_v46 = vsel %vm249_vm2, %v229_v44, 0.0  ;;  %v230_v47 = vrot.slane %v190_v7, 1  ;;  %v276_v50 = vsel %vm251_vm3, %v228_v41, 0.0 }
  0x98   :  { %v301_v60 = vmul.f32 %v170_v8, %v170_v8  ;;  %v302_v1 = vmul.f32 %v171_v9, %v171_v9  ;;  %v267_v4 = vadd.f32 %v266_v22, %v265_v20 }
  0x99   :  { %v137_v62 = vpop.permute.xlu0 %136  ;;  %v139_v63 = vpop.permute.xlu1 %138 }
  0x9a   :  { %341 = vrot.lane.b32.xlu1 %v300_v53, %s498_s0  ;;  %v172_v16 = vsub.f32 %v549_v12, %v137_v62  ;;  %343 = vrot.lane.b32.xlu0 %v301_v60, %s498_s0  ;;  %v173_v10 = vsub.f32 %v551_v13, %v139_v63  ;;  %v79_v12 = vsel %vm55_vm0, %v77_v30, %v78_v31 }
  0x9b   :  { %v269_v13 = vadd.f32 %v268_v5, %v267_v4  ;;  %v111_v40 = vsub.f32 %v557_v15, %v79_v12 }
  0x9c   :  { %v303_v2 = vmul.f32 %v172_v16, %v172_v16  ;;  %v304_v23 = vmul.f32 %v173_v10, %v173_v10 }
  0x9d   :  { %v141_v3 = vpop.permute.xlu0 %140  ;;  %v143_v21 = vpop.permute.xlu1 %142  ;;  %v271_v6 = vadd.f32 %v270_v37, %v269_v13  ;;  %v191_v43 = vmul.f32 %v111_v40, %v111_v40 }
  0x9e   :  { %345 = vrot.lane.b32.xlu1 %v302_v1, %s498_s0  ;;  %v174_v24 = vsub.f32 %v555_v14, %v141_v3  ;;  %347 = vrot.lane.b32.xlu0 %v303_v2, %s498_s0  ;;  %v175_v25 = vsub.f32 %v557_v15, %v143_v21 }
  0x9f   :  { %v273_v45 = vadd.f32 %v272_v42, %v271_v6  ;;  %v231_v48 = vrot.slane %v191_v43, 1 }
  0xa0   :  { %v305_v32 = vmul.f32 %v174_v24, %v174_v24  ;;  %v306_v33 = vmul.f32 %v175_v25, %v175_v25 }
  0xa1   :  { %v275_v49 = vadd.f32 %v274_v46, %v273_v45  ;;  %v232_v14 = vsel %vm208_vm1, %v230_v47, %v231_v48  ;;  %v280_v53 = vsel %vm251_vm3, %v231_v48, 0.0 }
  0xa2   :  { %349 = vrot.lane.b32.xlu1 %v304_v23, %s498_s0  ;;  %351 = vrot.lane.b32.xlu0 %v305_v32, %s498_s0  ;;  %v278_v15 = vsel %vm249_vm2, %v232_v14, 0.0 }
  0xa3   :  { %v277_v51 = vadd.f32 %v276_v50, %v275_v49 }
  0xa5   :  { %v279_v52 = vadd.f32 %v278_v15, %v277_v51 }
  0xa6   :  { %353 = vrot.lane.b32.xlu1 %v306_v33, %s498_s0 }
  0xa7   :  { %v281_v8 = vadd.f32 %v280_v53, %v279_v52  ;;  %v412_v52 = vlaneseq }
  0xa9   :  { %v415_v53 = vand.u32 127, %v412_v52 }
  0xab   :  { %vm417_vm5 = vcmp.eq.s32.totalorder %v415_v53, 1  ;;  %vm416_vm6 = vcmp.eq.s32.totalorder %v415_v53, 0 }
  0xc1   :  { %282 = vadd.xlane.f32.xlu0 %v281_v8  ;;  %v413_v8 = vshrl.u32 %v412_v52, 7 }
  0xc3   :  { %vm422_vm7 = vcmp.eq.s32.totalorder %v413_v8, 0 }
  0xf8   :  { %v324_v9 = vpop.permute.xlu0 %323 }
  0xf9   :  { %v372_v56 = vsel %vm371_vm4, %v324_v9, 0.0 }
  0xfc   :  { %v326_v54 = vpop.permute.xlu1 %325  ;;  %v328_v55 = vpop.permute.xlu0 %327 }
  0xfd   :  { %v373_v57 = vsel %vm371_vm4, %v326_v54, 0.0  ;;  %v375_v59 = vsel %vm371_vm4, %v328_v55, 0.0 }
  0xfe   :  { %v374_v58 = vadd.f32 %v373_v57, %v372_v56 }
 0x100   :  { %v376_v60 = vadd.f32 %v375_v59, %v374_v58  ;;  %v330_v61 = vpop.permute.xlu1 %329  ;;  %v332_v62 = vpop.permute.xlu0 %331 }
 0x101   :  { %v377_v63 = vsel %vm371_vm4, %v330_v61, 0.0  ;;  %v379_v0 = vsel %vm371_vm4, %v332_v62, 0.0 }
 0x102   :  { %v378_v1 = vadd.f32 %v377_v63, %v376_v60 }
 0x104   :  { %v380_v16 = vadd.f32 %v379_v0, %v378_v1  ;;  %v334_v10 = vpop.permute.xlu1 %333  ;;  %v336_v11 = vpop.permute.xlu0 %335 }
 0x105   :  { %v381_v17 = vsel %vm371_vm4, %v334_v10, 0.0  ;;  %v383_v18 = vsel %vm371_vm4, %v336_v11, 0.0 }
 0x106   :  { %v382_v19 = vadd.f32 %v381_v17, %v380_v16 }
 0x108   :  { %v384_v2 = vadd.f32 %v383_v18, %v382_v19  ;;  %v338_v20 = vpop.permute.xlu1 %337  ;;  %v340_v3 = vpop.permute.xlu0 %339 }
 0x109   :  { %v385_v21 = vsel %vm371_vm4, %v338_v20, 0.0  ;;  %v387_v22 = vsel %vm371_vm4, %v340_v3, 0.0 }
 0x10a   :  { %v386_v23 = vadd.f32 %v385_v21, %v384_v2 }
 0x10c   :  { %v388_v24 = vadd.f32 %v387_v22, %v386_v23  ;;  %v342_v25 = vpop.permute.xlu1 %341  ;;  %v344_v26 = vpop.permute.xlu0 %343 }
 0x10d   :  { %v389_v27 = vsel %vm371_vm4, %v342_v25, 0.0  ;;  %v391_v28 = vsel %vm371_vm4, %v344_v26, 0.0 }
 0x10e   :  { %v390_v29 = vadd.f32 %v389_v27, %v388_v24 }
 0x110   :  { %v392_v30 = vadd.f32 %v391_v28, %v390_v29  ;;  %v346_v31 = vpop.permute.xlu1 %345  ;;  %v348_v32 = vpop.permute.xlu0 %347 }
 0x111   :  { %v393_v4 = vsel %vm371_vm4, %v346_v31, 0.0  ;;  %v395_v5 = vsel %vm371_vm4, %v348_v32, 0.0 }
 0x112   :  { %v394_v33 = vadd.f32 %v393_v4, %v392_v30 }
 0x114   :  { %v396_v34 = vadd.f32 %v395_v5, %v394_v33  ;;  %v350_v35 = vpop.permute.xlu1 %349  ;;  %v352_v36 = vpop.permute.xlu0 %351 }
 0x115   :  { %v397_v12 = vsel %vm371_vm4, %v350_v35, 0.0  ;;  %v399_v13 = vsel %vm371_vm4, %v352_v36, 0.0 }
 0x116   :  { %v398_v37 = vadd.f32 %v397_v12, %v396_v34 }
 0x118   :  { %v400_v38 = vadd.f32 %v399_v13, %v398_v37  ;;  %v354_v39 = vpop.permute.xlu1 %353 }
 0x119   :  { %v401_v40 = vsel %vm371_vm4, %v354_v39, 0.0 }
 0x11a   :  { %v402_v41 = vadd.f32 %v401_v40, %v400_v38 }
 0x11c   :  { %403 = vadd.xlane.f32.xlu1 %v402_v41 }
 0x14a   :  { %v283_v6 = vpop.xlane.xlu0 %282 }
 0x14b   :  { %v284_v42 = vrot.slane %v283_v6, 4 }
 0x14d   :  { %v285_v7 = vadd.f32 %v284_v42, %v283_v6 }
 0x14f   :  { %v286_v43 = vrot.slane %v285_v7, 2 }
 0x151   :  { %v287_v44 = vadd.f32 %v286_v43, %v285_v7 }
 0x153   :  { %v288_v45 = vrot.slane %v287_v44, 1 }
 0x155   :  { %v289_v46 = vadd.f32 %v288_v45, %v287_v44 }
 0x157   :  { %440 = vpush %v289_v46 }
 0x188   :  { %s441_s14 = spop %440 }
 0x189   :  { %v420_v54 = vstv %s441_s14 }
 0x1a5   :  { %v404_v47 = vpop.xlane.xlu1 %403 }
 0x1a6   :  { %v405_v48 = vrot.slane %v404_v47, 4 }
 0x1a8   :  { %v406_v49 = vadd.f32 %v405_v48, %v404_v47 }
 0x1aa   :  { %v407_v50 = vrot.slane %v406_v49, 2 }
 0x1ac   :  { %v408_v14 = vadd.f32 %v407_v50, %v406_v49 }
 0x1ae   :  { %v409_v51 = vrot.slane %v408_v14, 1 }
 0x1b0   :  { %v410_v15 = vadd.f32 %v409_v51, %v408_v14 }
 0x1b2   :  { %442 = vpush %v410_v15 }
 0x1e3   :  { %s443_s15 = spop %442 }
 0x1e4   :  { %v418_v9 = vstv %s443_s15 }
 0x1e5   :  { %v419_v55 = vsel %vm417_vm5, %v418_v9, 0.0 }
 0x1e6   :  { %v421_v56 = vsel %vm416_vm6, %v420_v54, %v419_v55 }
 0x1e7   :  { %v423_v57 = vsel %vm422_vm7, %v421_v56, 0.0 }
 0x1e8   :  { %424 = vst [vmem:[#allocation5] sm:$0xff] %v423_v57 }
 0x1e9   :  { %481 = shalt.err (!%p478_p9)
}
 0x1ea   :  { %434 = dma.vmem_to_hbm [thread:$0]  %s432_s17, 128, %s677_s1, [#allocation4]  }
 0x1eb   :  { %492 = dma.done.wait [#allocation4], 128  }
 0x1ec   :  { %493 = vsyncadd [#allocation4], 4294967168 }
 0x1ed   :  { %438 = vsyncpa [#allocation3], 1 }
 0x1ee   :  { %439 = vsyncpa [#allocation4], 1 }

</bundles_post_ra>
